<compile_context>
chip_gen: v6e
topology: v6e:2x2x1
jax: 0.10.0
libtpu: 0.0.40
codegen_flags: <defaults>
</compile_context>

<pallas_src>
import jax
import jax.numpy as jnp
from jax.experimental import pallas as pl
from jax.experimental.pallas import tpu as pltpu


def _round_up(x, m):
    return (x + m - 1) // m * m


# ----------------------------- Pallas kernel ------------------------------ #

def _linear_kernel(x_ref, w_ref, b_ref, o_ref):
    """o = x @ w + b for one batch tile.

    x_ref: (TM, K)  f32   -- tile of flattened inputs (cast to bf16 in-kernel)
    w_ref: (K,  Np) bf16  -- weight matrix, out-dim zero-padded to 128 lanes
    b_ref: (1,  Np) f32   -- zero-padded bias row
    o_ref: (TM, Np) f32   -- lane-dense logits tile
    """
    x_bf16 = x_ref[...].astype(jnp.bfloat16)          # cast hides under DMA
    acc = jnp.dot(x_bf16, w_ref[...], preferred_element_type=jnp.float32)
    o_ref[...] = acc + b_ref[...]


# ------------------------------ JAX wrapper -------------------------------- #

def mclr_forward(x, params, *, out_dim=10, tm=512):
    """Equivalent of Mclr_CrossEntropy.forward: flatten(x, 1) then linear."""
    n = x.shape[0]
    x2 = x.reshape(n, -1)                 # torch.flatten(x, 1); no extra copy/cast pass
    k = x2.shape[1]

    w = params["w"]                       # (K, Np) bf16, out-dim zero padded
    b = params["b"]                       # (1, Np) f32, zero padded
    kw, np_out = w.shape
    assert kw == k, (kw, k)

    # Batch tile: above the DMA-efficiency knee, within v7x's VMEM budget, and
    # split into >=2 grid steps when n allows (feeds both v7x TensorCores).
    # The ragged last tile is masked by Pallas -> no batch padding work.
    if n <= 8:
        tm_eff = n
    else:
        tm_eff = max(8, min(tm, _round_up(-(-n // 2), 8)))
    grid = (pl.cdiv(n, tm_eff),)

    cost = pl.CostEstimate(
        flops=2 * n * k * np_out,
        bytes_accessed=(n * k * x2.dtype.itemsize
                        + w.size * w.dtype.itemsize
                        + b.size * b.dtype.itemsize
                        + n * np_out * 4),
        transcendentals=0,
    )

    out = pl.pallas_call(
        _linear_kernel,
        out_shape=jax.ShapeDtypeStruct((n, np_out), jnp.float32),
        grid=grid,
        in_specs=[
            # Last dim (784) == full array dim, so non-multiple-of-128 is legal.
            pl.BlockSpec((tm_eff, k), lambda i: (i, 0)),
            # w / b: constant index maps -> fetched once, reused every step.
            pl.BlockSpec((kw, np_out), lambda i: (0, 0)),
            pl.BlockSpec((1, np_out), lambda i: (0, 0)),
        ],
        out_specs=pl.BlockSpec((tm_eff, np_out), lambda i: (i, 0)),
        compiler_params=pltpu.CompilerParams(
            dimension_semantics=("parallel",)),
        cost_estimate=cost,
    )(x2, w, b)

    # Only the class padding (10 -> 128) remains to slice off.  No softmax: the
    # PyTorch module returns raw linear outputs.
    return out[:, :out_dim]


def init_params(key, input_dim=784, output_dim=10):
    """PyTorch-style Linear init, re-packed lane-dense for the kernel."""
    kw, kb = jax.random.split(key)
    bound = 1.0 / jnp.sqrt(jnp.float32(input_dim))
    w_t = jax.random.uniform(kw, (output_dim, input_dim), jnp.float32, -bound, bound)
    b_t = jax.random.uniform(kb, (output_dim,), jnp.float32, -bound, bound)

    np_out = _round_up(output_dim, 128)   # 10 -> 128 (lane-dense output)

    # (out, in) -> (in, out), zero-padded in the out dim, bf16 for the MXU.
    w = jnp.zeros((input_dim, np_out), jnp.bfloat16).at[:, :output_dim].set(
        w_t.T.astype(jnp.bfloat16))
    b = jnp.zeros((1, np_out), jnp.float32).at[0, :output_dim].set(b_t)
    return {"w": w, "b": b}


if __name__ == "__main__":
    key = jax.random.PRNGKey(0)
    kx, kparam = jax.random.split(key)

    # MNIST-like input: flattens to input_dim = 784, matching Linear(784, 10).
    x = jax.random.normal(kx, (2, 1, 28, 28), jnp.float32)
    params = init_params(kparam, input_dim=784, output_dim=10)

    out = jax.jit(mclr_forward)(x, params)
    out = jax.block_until_ready(out)
    assert out.shape == (2, 10)

    # Reference (same bf16 weights, f32 math) -- documents the bf16-x tolerance.
    x2 = x.reshape(2, -1)
    ref = x2 @ params["w"][:, :10].astype(jnp.float32) + params["b"][0, :10]
    assert jnp.allclose(out, ref, rtol=5e-2, atol=2e-2), float(
        jnp.max(jnp.abs(out - ref)))

    print("KERNEL_OK")
</pallas_src>

<mosaic_0001>
module attributes {stable_mosaic.version = 11 : i64} {
  func.func @_linear_kernel(%arg0: i32, %arg1: memref<2x784xf32, #tpu.memory_space<vmem>>, %arg2: memref<784x128xbf16, #tpu.memory_space<vmem>>, %arg3: memref<1x128xf32, #tpu.memory_space<vmem>>, %arg4: memref<2x128xf32, #tpu.memory_space<vmem>>) attributes {dimension_semantics = [#tpu.dimension_semantics<parallel>], iteration_bounds = array<i64: 1>, scalar_prefetch = 0 : i64, scratch_operands = 0 : i64, tpu.core_type = #tpu.core_type<tc>, window_params = [{transform_indices = @transform_0, window_bounds = array<i64: 2, 784>}, {pipeline_mode = #tpu.pipeline_mode<synchronous>, transform_indices = @transform_1, window_bounds = array<i64: 784, 128>}, {pipeline_mode = #tpu.pipeline_mode<synchronous>, transform_indices = @transform_2, window_bounds = array<i64: 1, 128>}, {transform_indices = @transform_3, window_bounds = array<i64: 2, 128>}]} {
    %c0 = arith.constant 0 : index
    %c0_0 = arith.constant 0 : index
    %0 = vector.load %arg1[%c0, %c0_0] : memref<2x784xf32, #tpu.memory_space<vmem>>, vector<2x784xf32>
    %1 = arith.truncf %0 : vector<2x784xf32> to vector<2x784xbf16>
    %c0_1 = arith.constant 0 : index
    %c0_2 = arith.constant 0 : index
    %2 = vector.load %arg2[%c0_1, %c0_2] : memref<784x128xbf16, #tpu.memory_space<vmem>>, vector<784x128xbf16>
    %cst = arith.constant dense<0.000000e+00> : vector<2x128xf32>
    %3 = tpu.matmul %1, %2, %cst {dimension_numbers = #tpu.dot_dimension_numbers<[1], [0], [0], [1], [0, 0, 1, 1], [], []>} : vector<2x784xbf16>, vector<784x128xbf16>, vector<2x128xf32> -> vector<2x128xf32>
    %c0_3 = arith.constant 0 : index
    %c0_4 = arith.constant 0 : index
    %4 = vector.load %arg3[%c0_3, %c0_4] : memref<1x128xf32, #tpu.memory_space<vmem>>, vector<1x128xf32>
    %5 = vector.broadcast %4 : vector<1x128xf32> to vector<2x128xf32>
    %6 = arith.addf %3, %5 : vector<2x128xf32>
    %c0_5 = arith.constant 0 : index
    %c0_6 = arith.constant 0 : index
    %7 = vector.load %arg4[%c0_5, %c0_6] : memref<2x128xf32, #tpu.memory_space<vmem>>, vector<2x128xf32>
    tpu.vector_store %arg4[%c0_5, %c0_6], %6 {strides = array<i32>} : memref<2x128xf32, #tpu.memory_space<vmem>>, vector<2x128xf32>,
    return
  }
  func.func @transform_0(%arg0: i32) -> (i32, i32) {
    %c0_i32 = arith.constant 0 : i32
    %c0_i32_0 = arith.constant 0 : i32
    return %arg0, %c0_i32 : i32, i32
  }
  func.func @transform_1(%arg0: i32) -> (i32, i32) {
    %c0_i32 = arith.constant 0 : i32
    %c0_i32_0 = arith.constant 0 : i32
    %c0_i32_1 = arith.constant 0 : i32
    return %c0_i32, %c0_i32_0 : i32, i32
  }
  func.func @transform_2(%arg0: i32) -> (i32, i32) {
    %c0_i32 = arith.constant 0 : i32
    %c0_i32_0 = arith.constant 0 : i32
    %c0_i32_1 = arith.constant 0 : i32
    return %c0_i32, %c0_i32_0 : i32, i32
  }
  func.func @transform_3(%arg0: i32) -> (i32, i32) {
    %c0_i32 = arith.constant 0 : i32
    %c0_i32_0 = arith.constant 0 : i32
    return %arg0, %c0_i32 : i32, i32
  }
}

</mosaic_0001>

<bundles_post_ra>
// kernel: mclr_forward.1
= control target key start
LH: loop header
LB: loop body
LE: loop exit
PB: predicated region body
PF: predicated region fallthrough
CT: control target
= control target key end

     0   :  { %8 = vsyncpa [#allocation3], 0  ;;  %s929_s0 = inlined_call_operand.vmem [shape: f32[2,784], index: 0, kind: input, shape index: {}]   ;;  %s930_s1 = inlined_call_operand.hbm [shape: bf16[784,128], index: 1, kind: input, shape index: {}]   ;;  %s931_s2 = inlined_call_operand.vmem [shape: f32[1,128], index: 2, kind: input, shape index: {}]   ;;  %s932_s3 = inlined_call_operand.hbm [shape: f32[2,128], index: 3, kind: output, shape index: {}]  }
   0x1   :  { %9 = vsyncpa [#allocation4], 0  ;;  %s887_s12 = smov [#allocation2]  }
   0x2   :  { %s17_s13 = sshll.u32 %s887_s12, 4  ;;  %s18_s13 = int_to_ptr.vmem [resolvable:$true] %s17_s13 }
   0x3   :  { %s851_s14 = scalar_lea.vmem %s18_s13, 6272  ;;  %p856_p1 = scmp.lt.s32.totalorder %s18_s13, %s18_s13 }
   0x4   :  { %p852_p0 = scmp.ne.s32.totalorder %s18_s13, %s851_s14  ;;  %p857_p2 = scmp.lt.s32.totalorder %s851_s14, %s851_s14 }
   0x6   :  { %p858_p3 = por %p857_p2, %p856_p1 }
   0x8   :  { %p859_p4 = pnand %p858_p3, %p852_p0 }
   0xa   :  { %862 = shalt.err (!%p859_p4)
}
   0xb   :  { %s888_s15 = smov 64   ;;  %s889_s16 = smov 4  }
   0xc   :  { %23 = dma.hbm_to_vmem [thread:$0]  %s930_s1, 6272, %s18_s13, [#allocation3], %s888_s15, %s888_s15, %s889_s16  }
   0xd   :  { %883 = dma.done.wait [#allocation3], 6272  }
   0xe   :  { %884 = vsyncadd [#allocation3], 4294961024  ;;  %v792_v0 = vld [vmem:[#allocation2 + $0x78] sm:$0xff]   ;;  %v796_v4 = vld [vmem:[#allocation2 + $0x70] sm:$0xff]   ;;  %v890_v21 = vmov 1983009808   ;;  %v38_v23 = vlaneseq }
   0xf   :  { %v793_v1 = vld [vmem:[#allocation2 + $0x38] sm:$0xff]   ;;  %711 = vmatprep.subr.bf16.mxu0 %v792_v0  ;;  %v797_v5 = vld [vmem:[#allocation2 + $0x30] sm:$0xff]   ;;  %v800_v8 = vld [vmem:[#allocation2 + $0x68] sm:$0xff]   ;;  %v36_v22 = vunpack.c.l.s4 %v890_v21  ;;  %v891_v45 = vmov 0.0   ;;  %vm892_vm0 = vmmov 0   ;;  %vm480_vm1 = vcmask 130048  }
  0x10   :  { %v794_v2 = vld [vmem:[#allocation2 + $0xf8] sm:$0xff]   ;;  %712 = vmatpush3.bf16.msra.mxu0 %v793_v1  ;;  %v798_v6 = vld [vmem:[#allocation2 + $0xf0] sm:$0xff]   ;;  %v801_v9 = vld [vmem:[#allocation2 + $0x28] sm:$0xff]   ;;  %v39_v29 = vshrl.u32 %v38_v23, 7  ;;  %s893_s23 = smov [#allocation5]  }
  0x11   :  { %v795_v3 = vld [vmem:[#allocation2 + $0xb8] sm:$0xff]   ;;  %733 = vmatprep.subr.bf16.mxu1 %v794_v2  ;;  %713 = vmatprep.subr.bf16.mxu0 %v796_v4  ;;  %v799_v7 = vld [vmem:[#allocation2 + $0xb0] sm:$0xff]   ;;  %v802_v10 = vld [vmem:[#allocation2 + $0xe8] sm:$0xff]   ;;  %v37_v28 = vunpack.c.0.s8 %v36_v22  ;;  %s651_s24 = sshll.u32 %s893_s23, 4  ;;  %s652_s24 = int_to_ptr.vmem [resolvable:$true] %s651_s24 }
  0x12   :  { %734 = vmatpush3.bf16.msra.mxu1 %v795_v3  ;;  %v803_v11 = vld [vmem:[#allocation2 + $0xa8] sm:$0xff]   ;;  %v804_v12 = vld [vmem:[#allocation2 + $0x60] sm:$0xff]   ;;  %v808_v16 = vld [vmem:[#allocation2 + $0x58] sm:$0xff]   ;;  %s863_s25 = scalar_lea.vmem %s652_s24, 32  ;;  %p868_p6 = scmp.lt.s32.totalorder %s652_s24, %s652_s24 }
  0x13   :  { %735 = vmatprep.subr.bf16.mxu1 %v798_v6  ;;  %v805_v13 = vld [vmem:[#allocation2 + $0x20] sm:$0xff]   ;;  %v809_v17 = vld [vmem:[#allocation2 + $0x18] sm:$0xff]   ;;  %v812_v20 = vld [vmem:[#allocation2 + $0x50] sm:$0xff]   ;;  %v40_v34 = vsub.s32 %v37_v28, %v39_v29  ;;  %p864_p5 = scmp.ne.s32.totalorder %s652_s24, %s863_s25  ;;  %p869_p7 = scmp.lt.s32.totalorder %s863_s25, %s863_s25 }
  0x14   :  { %714 = vmatpush3.bf16.msra.mxu0 %v797_v5  ;;  %v806_v14 = vld [vmem:[#allocation2 + $0xe0] sm:$0xff]   ;;  %v810_v18 = vld [vmem:[#allocation2 + $0xd8] sm:$0xff]   ;;  %v813_v24 = vld [vmem:[#allocation2 + $0x10] sm:$0xff]  }
  0x15   :  { %715 = vmatprep.subr.bf16.mxu0 %v800_v8  ;;  %v807_v15 = vld [vmem:[#allocation2 + $0xa0] sm:$0xff]   ;;  %v811_v19 = vld [vmem:[#allocation2 + $0x98] sm:$0xff]   ;;  %v814_v25 = vld [vmem:[#allocation2 + $0xd0] sm:$0xff]   ;;  %p870_p8 = por %p869_p7, %p868_p6 }
  0x16   :  { %736 = vmatpush3.bf16.msra.mxu1 %v799_v7  ;;  %v815_v26 = vld [vmem:[#allocation2 + $0x90] sm:$0xff]   ;;  %v816_v27 = vld [vmem:[#allocation2 + $0x48] sm:$0xff]   ;;  %v820_v33 = vld [vmem:[#allocation2 + $0x40] sm:$0xff]  }
  0x17   :  { %737 = vmatprep.subr.bf16.mxu1 %v802_v10  ;;  %v817_v30 = vld [vmem:[#allocation2 + $0x8] sm:$0xff]   ;;  %v821_v35 = vld [vmem:[#allocation2] sm:$0xff]   ;;  %v824_v41 = vld [vmem:[#allocation2 + $0x178] sm:$0xff]   ;;  %p871_p9 = pnand %p870_p8, %p864_p5 }
  0x18   :  { %716 = vmatpush3.bf16.msra.mxu0 %v801_v9  ;;  %v818_v31 = vld [vmem:[#allocation2 + $0xc8] sm:$0xff]   ;;  %v822_v36 = vld [vmem:[#allocation2 + $0xc0] sm:$0xff]   ;;  %v826_v48 = vld [vmem:[#allocation2 + $0x138] sm:$0xff]  }
  0x19   :  { %717 = vmatprep.subr.bf16.mxu0 %v804_v12  ;;  %v819_v32 = vld [vmem:[#allocation2 + $0x88] sm:$0xff]   ;;  %v30_v37 = vld [vmem:[%s929_s0] sm:$0xff]  ;;  %v827_v50 = vld [vmem:[#allocation2 + $0x170] sm:$0xff]  }
  0x1a   :  { %738 = vmatpush3.bf16.msra.mxu1 %v803_v11  ;;  %v41_v38 = vrot.slane %v30_v37, %v40_v34  ;;  %v823_v39 = vld [vmem:[#allocation2 + $0x80] sm:$0xff]   ;;  %v34_v40 = vcombine.high %v30_v37, %v30_v37  ;;  %v828_v52 = vld [vmem:[#allocation2 + $0x130] sm:$0xff]   ;;  %v829_v53 = vld [vmem:[#allocation2 + $0x168] sm:$0xff]  }
  0x1b   :  { %739 = vmatprep.subr.bf16.mxu1 %v806_v14  ;;  %v830_v54 = vld [vmem:[#allocation2 + $0x128] sm:$0xff]   ;;  %v831_v55 = vld [vmem:[#allocation2 + $0x160] sm:$0xff]   ;;  %v833_v58 = vld [vmem:[#allocation2 + $0x158] sm:$0xff]  }
  0x1c   :  { %718 = vmatpush3.bf16.msra.mxu0 %v805_v13  ;;  %v49_v42 = vcombine.high %v41_v38, %v41_v38  ;;  %v48_v43 = vrot.slane %v34_v40, %v40_v34  ;;  %v74_v44 = vpack.c.bf16 %v41_v38, %v41_v38  ;;  %v839_v56 = vld [vmem:[#allocation2 + $0x180] sm:$0xff]   ;;  %v31_v59 = vld [vmem:[%s929_s0 + $0x8] sm:$0x3f]  ;;  %v834_v62 = vld [vmem:[#allocation2 + $0x118] sm:$0xff]  }
  0x1d   :  { %719 = vmatprep.subr.bf16.mxu0 %v808_v16  ;;  %v832_v57 = vld [vmem:[#allocation2 + $0x120] sm:$0xff]   ;;  %v51_v60 = vcombine.high %v31_v59, %v31_v59  ;;  %v58_v61 = vrot.slane %v31_v59, %v40_v34  ;;  %v835_v1 = vld [vmem:[#allocation2 + $0x150] sm:$0xff]   ;;  %v837_v5 = vld [vmem:[#allocation2 + $0x148] sm:$0xff]  }
  0x1e   :  { %740 = vmatpush3.bf16.msra.mxu1 %v807_v15  ;;  %v75_v46 = vpack.c.bf16 %v49_v42, %v49_v42  ;;  %v50_v47 = vcombine.high %v48_v43, %v48_v43  ;;  %v76_v49 = vpack.c.bf16 %v48_v43, %v48_v43  ;;  %v836_v4 = vld [vmem:[#allocation2 + $0x110] sm:$0xff]   ;;  %v838_v6 = vld [vmem:[#allocation2 + $0x108] sm:$0xff]   ;;  %v840_v7 = vld [vmem:[#allocation2 + $0x140] sm:$0xff]  }
  0x1f   :  { %741 = vmatprep.subr.bf16.mxu1 %v810_v18  ;;  %v65_v63 = vrot.slane %v51_v60, %v40_v34  ;;  %v66_v0 = vcombine.high %v58_v61, %v58_v61  ;;  %v841_v8 = vld [vmem:[#allocation2 + $0x100] sm:$0xff]   ;;  %v78_v9 = vpack.c.bf16 %v58_v61, %v58_v61 }
  0x20   :  { %720 = vmatpush3.bf16.msra.mxu0 %v809_v17  ;;  %516 = vmatprep.mubr.bf16.mxu0 %v75_v46  ;;  %v77_v51 = vpack.c.bf16 %v50_v47, %v50_v47  ;;  %v660_v23 = vld [vmem:[%s931_s2] ss:$0 sm:$0xff] }
  0x21   :  { %721 = vmatprep.subr.bf16.mxu0 %v812_v20  ;;  %v80_v2 = vpack.c.bf16 %v65_v63, %v65_v63  ;;  %v79_v3 = vpack.c.bf16 %v66_v0, %v66_v0 }
  0x22   :  { %742 = vmatpush3.bf16.msra.mxu1 %v811_v19  ;;  %556 = vmatprep.mubr.bf16.mxu1 %v77_v51 }
  0x23   :  { %743 = vmatprep.subr.bf16.mxu1 %v814_v25 }
  0x24   :  { %722 = vmatpush3.bf16.msra.mxu0 %v813_v24 }
  0x25   :  { %723 = vmatprep.subr.bf16.mxu0 %v816_v27 }
  0x26   :  { %744 = vmatpush3.bf16.msra.mxu1 %v815_v26 }
  0x27   :  { %745 = vmatprep.subr.bf16.mxu1 %v818_v31 }
  0x28   :  { %724 = vmatpush3.bf16.msra.mxu0 %v817_v30 }
  0x29   :  { %725 = vmatprep.subr.bf16.mxu0 %v820_v33 }
  0x2a   :  { %746 = vmatpush3.bf16.msra.mxu1 %v819_v32 }
  0x2b   :  { %747 = vmatprep.subr.bf16.mxu1 %v822_v36 }
  0x2c   :  { %726 = vmatpush3.bf16.msra.mxu0 %v821_v35 }
  0x2d   :  { %755 = vmatprep.subr.bf16.mxu0 %v824_v41 }
  0x2e   :  { %748 = vmatpush3.bf16.msra.mxu1 %v823_v39 }
  0x2f   :  { %779 = vmatprep.subr.bf16.mxu1 %v891_v45  ;;  %517 = vmatmul.mubr.bf16.vlgmr.msra.gmra.mxu0 %v74_v44 }
  0x30   :  { %756 = vmatpush3.bf16.msra.mxu0 %v826_v48  ;;  %596 = vmatprep.mubr.bf16.mxu0 %v79_v3 }
  0x31   :  { %557 = vmatmul.mubr.bf16.vlgmr.msra.gmra.mxu1 %v76_v49  ;;  %757 = vmatprep.subr.bf16.mxu0 %v827_v50 }
  0x32   :  { %781 = vmatprep.mubr.msk.bf16.mxu1 %vm892_vm0, %v891_v45  ;;  %780 = vmatpush3.bf16.msra.mxu1 %v839_v56 }
  0x34   :  { %758 = vmatpush3.bf16.msra.mxu0 %v828_v52 }
  0x35   :  { %759 = vmatprep.subr.bf16.mxu0 %v829_v53 }
  0x38   :  { %760 = vmatpush3.bf16.msra.mxu0 %v830_v54 }
  0x39   :  { %761 = vmatprep.subr.bf16.mxu0 %v831_v55  ;;  %782 = vmatmul.mubr.msk.bf16.vlgmr.msra.gmra.mxu1 %vm480_vm1, %v80_v2 }
  0x3c   :  { %762 = vmatpush3.bf16.msra.mxu0 %v832_v57 }
  0x3d   :  { %763 = vmatprep.subr.bf16.mxu0 %v833_v58 }
  0x40   :  { %764 = vmatpush3.bf16.msra.mxu0 %v834_v62 }
  0x41   :  { %765 = vmatprep.subr.bf16.mxu0 %v835_v1 }
  0x44   :  { %766 = vmatpush3.bf16.msra.mxu0 %v836_v4 }
  0x45   :  { %767 = vmatprep.subr.bf16.mxu0 %v837_v5 }
  0x48   :  { %768 = vmatpush3.bf16.msra.mxu0 %v838_v6 }
  0x49   :  { %769 = vmatprep.subr.bf16.mxu0 %v840_v7 }
  0x4c   :  { %770 = vmatpush3.bf16.msra.mxu0 %v841_v8 }
  0x4f   :  { %597 = vmatmul.mubr.bf16.vlgmr.msra.gmra.mxu0 %v78_v9 }
  0xef   :  { %v727_v10 = vpop.f32.mrf.mxu0 }
  0xf1   :  { %v728_v11 = vpop.f32.mrf.mxu0  ;;  %v749_v12 = vpop.f32.mrf.mxu1 }
  0xf2   :  { %v729_v22 = vadd.f32 %v728_v11, %v727_v10 }
  0xf3   :  { %v730_v13 = vpop.f32.mrf.mxu0  ;;  %v750_v14 = vpop.f32.mrf.mxu1 }
  0xf4   :  { %v519_v24 = vadd.f32 %v729_v22, %v660_v23  ;;  %v751_v25 = vadd.f32 %v750_v14, %v749_v12 }
  0xf5   :  { %v731_v15 = vpop.f32.mrf.mxu0  ;;  %v752_v16 = vpop.f32.mrf.mxu1 }
  0xf6   :  { %v559_v28 = vadd.f32 %v751_v25, %v519_v24 }
  0xf7   :  { %v753_v17 = vpop.f32.mrf.mxu1 }
  0xf9   :  { %v638_v18 = vpop.f32.mrf.mxu1 }
  0xfb   :  { %v783_v19 = vpop.f32.mrf.mxu1 }
  0xfd   :  { %v641_v20 = vpop.f32.mrf.mxu1 }
  0xff   :  { %v784_v21 = vpop.f32.mrf.mxu1 }
 0x10f   :  { %v771_v26 = vpop.f32.mrf.mxu0 }
 0x111   :  { %v772_v27 = vpop.f32.mrf.mxu0 }
 0x112   :  { %v773_v29 = vadd.f32 %v772_v27, %v771_v26 }
 0x113   :  { %v774_v30 = vpop.f32.mrf.mxu0 }
 0x114   :  { %v599_v31 = vadd.f32 %v773_v29, %v559_v28 }
 0x115   :  { %v775_v32 = vpop.f32.mrf.mxu0 }
 0x116   :  { %v639_v33 = vadd.f32 %v638_v18, %v599_v31 }
 0x118   :  { %644 = vst [vmem:[#allocation5] sm:$0x3] %v639_v33 }
 0x119   :  { %874 = shalt.err (!%p871_p9)
}
 0x11a   :  { %654 = dma.vmem_to_hbm [thread:$0]  %s652_s24, 32, %s932_s3, [#allocation4]  }
 0x11b   :  { %885 = dma.done.wait [#allocation4], 32  }
 0x11c   :  { %886 = vsyncadd [#allocation4], 4294967264 }
 0x11d   :  { %658 = vsyncpa [#allocation3], 1 }
 0x11e   :  { %659 = vsyncpa [#allocation4], 1 }

</bundles_post_ra>
